<compile_context>
chip_gen: v7x
topology: tpu7x:2x2x1
jax: 0.10.0
libtpu: 0.0.40
codegen_flags: <defaults>
</compile_context>

<pallas_src>
import math
from functools import partial

import jax
import jax.numpy as jnp
from jax.experimental import pallas as pl
from jax.experimental.pallas import tpu as pltpu


def get_same_padding(x, kernel_sz, stride, dilation):
    return max((math.ceil(x / stride) - 1) * stride + (kernel_sz - 1) * dilation + 1 - x, 0)


def _round_up(x, m):
    return (x + m - 1) // m * m


# ---------------- Pass 1: conv (shifted matmuls over phase layout) + BN statistics ----------------
def _conv_stats_kernel(x_ref, w_ref, y_ref, sum_ref, sqsum_ref, *,
                       oh, ow, kk_h, kk_w, cg, coutp):
    n = pl.program_id(0)
    rows = oh * ow

    ximg = x_ref[0]          # (P_h, P_w, Cg) bf16
    wall = w_ref[...]        # (kk_h, kk_w, Cg, Coutp) bf16

    # Conv bias intentionally omitted: BatchNorm subtracts the per-channel batch mean
    # right after the conv, so a per-channel bias cancels exactly in the forward pass.
    acc = jnp.zeros((rows, coutp), jnp.float32)
    for a in range(kk_h):
        for b in range(kk_w):
            win = ximg[a:a + oh, b:b + ow, :]                    # (oh, ow, cg)
            acc = acc + jnp.dot(win.reshape(rows, cg), wall[a, b],
                                preferred_element_type=jnp.float32)
    y_ref[0] = acc

    # Per-channel statistics accumulated across the whole (arbitrary) image grid.
    @pl.when(n == 0)
    def _():
        sum_ref[...] = jnp.zeros_like(sum_ref)
        sqsum_ref[...] = jnp.zeros_like(sqsum_ref)

    sum_ref[...] += jnp.sum(acc, axis=0, keepdims=True)
    sqsum_ref[...] += jnp.sum(acc * acc, axis=0, keepdims=True)


# ---------------- Pass 2: BatchNorm affine + LeakyReLU(0.2) ----------------
def _bn_lrelu_kernel(y_ref, scale_ref, shift_ref, o_ref):
    z = y_ref[0] * scale_ref[...] + shift_ref[...]
    o_ref[0] = jnp.where(z >= 0.0, z, 0.2 * z)


def generator_encoder_block(x, w, b, gamma, beta, *, stride, kernel_size, eps=1e-5):
    """Forward of GeneratorEncoderBlock (batch_norm=True path).

    x: (N, Cin, H, W) f32 (NCHW), w: (Cout, Cin, k, k), b/gamma/beta: (Cout,).
    Returns (N, Cout, OH, OW) f32 (training-mode BN forward; running stats not updated).
    """
    del b  # per-channel conv bias is a forward no-op under BatchNorm (mean subtraction).
    N, Cin, H, W = x.shape
    Cout = w.shape[0]
    k, s = kernel_size, stride

    # ---- pad_same (TF "SAME"-style padding, matching the PyTorch helper) ----
    pad_h = get_same_padding(H, k, s, 1)
    pad_w = get_same_padding(W, k, s, 1)
    Hp, Wp = H + pad_h, W + pad_w
    OH = (Hp - k) // s + 1
    OW = (Wp - k) // s + 1

    # ---- zero-duplication space-to-depth ("phase") layout ----
    kk_h = -(-k // s)                 # ceil(k/s) shifted taps per spatial axis
    kk_w = kk_h
    P_h, P_w = OH + kk_h - 1, OW + kk_w - 1
    Ht, Wt = P_h * s, P_w * s         # always >= Hp, Wp; extra zeros hit zero weights only
    Cg = s * s * Cin

    x_nhwc = jnp.transpose(x, (0, 2, 3, 1)).astype(jnp.float32)
    x_pad = jnp.pad(x_nhwc, ((0, 0),
                             (pad_h // 2, Ht - H - pad_h // 2),
                             (pad_w // 2, Wt - W - pad_w // 2),
                             (0, 0)))
    x_phase = x_pad.reshape(N, P_h, s, P_w, s, Cin)
    x_phase = x_phase.transpose(0, 1, 3, 2, 4, 5).reshape(N, P_h, P_w, Cg)
    x_phase = x_phase.astype(jnp.bfloat16)            # bf16 MXU inputs, f32 accumulation

    # ---- weight: (Cout, Cin, k, k) -> (kk_h, kk_w, Cg, Coutp), lane-dense Cout ----
    Coutp = _round_up(Cout, 128)
    Kh_pad, Kw_pad = kk_h * s, kk_w * s
    w_p = jnp.pad(w.astype(jnp.float32), ((0, 0), (0, 0), (0, Kh_pad - k), (0, Kw_pad - k)))
    w_p = w_p.reshape(Cout, Cin, kk_h, s, kk_w, s)
    w_p = w_p.transpose(2, 4, 3, 5, 1, 0).reshape(kk_h, kk_w, Cg, Cout)
    w_p = jnp.pad(w_p, ((0, 0), (0, 0), (0, 0), (0, Coutp - Cout))).astype(jnp.bfloat16)

    R = OH * OW
    rowsN = N * R

    # ---- Pass 1: conv + per-channel sum / sum-of-squares ----
    kernel1 = partial(_conv_stats_kernel, oh=OH, ow=OW, kk_h=kk_h, kk_w=kk_w,
                      cg=Cg, coutp=Coutp)
    flops1 = 2 * rowsN * (kk_h * kk_w * Cg) * Coutp
    bytes1 = x_phase.size * 2 + w_p.size * 2 + rowsN * Coutp * 4 + 2 * Coutp * 4
    y_conv, ch_sum, ch_sqsum = pl.pallas_call(
        kernel1,
        out_shape=(
            jax.ShapeDtypeStruct((N, R, Coutp), jnp.float32),
            jax.ShapeDtypeStruct((1, Coutp), jnp.float32),
            jax.ShapeDtypeStruct((1, Coutp), jnp.float32),
        ),
        grid_spec=pltpu.PrefetchScalarGridSpec(
            num_scalar_prefetch=0,
            grid=(N,),
            in_specs=[
                pl.BlockSpec((1, P_h, P_w, Cg), lambda n: (n, 0, 0, 0)),
                pl.BlockSpec((kk_h, kk_w, Cg, Coutp), lambda n: (0, 0, 0, 0)),
            ],
            out_specs=(
                pl.BlockSpec((1, R, Coutp), lambda n: (n, 0, 0)),
                pl.BlockSpec((1, Coutp), lambda n: (0, 0)),
                pl.BlockSpec((1, Coutp), lambda n: (0, 0)),
            ),
        ),
        compiler_params=pltpu.CompilerParams(
            dimension_semantics=("arbitrary",),   # stats reduce across the image axis
            vmem_limit_bytes=32 * 1024 * 1024,
        ),
        cost_estimate=pl.CostEstimate(flops=flops1, transcendentals=0, bytes_accessed=bytes1),
    )(x_phase, w_p)

    # ---- finalize BN statistics (tiny per-channel vectors; plain XLA) ----
    cnt = jnp.float32(rowsN)
    mean = ch_sum / cnt
    var = jnp.maximum(ch_sqsum / cnt - mean * mean, 0.0)   # biased batch variance (train mode)
    inv = jax.lax.rsqrt(var + eps)
    gamma_p = jnp.pad(gamma.astype(jnp.float32).reshape(1, Cout), ((0, 0), (0, Coutp - Cout)))
    beta_p = jnp.pad(beta.astype(jnp.float32).reshape(1, Cout), ((0, 0), (0, Coutp - Cout)))
    scale = gamma_p * inv                  # (1, Coutp)
    shift = beta_p - mean * scale          # (1, Coutp)

    # ---- Pass 2: normalize + LeakyReLU(0.2), parallel over images ----
    flops2 = 3 * rowsN * Coutp
    bytes2 = 2 * rowsN * Coutp * 4
    out = pl.pallas_call(
        _bn_lrelu_kernel,
        out_shape=jax.ShapeDtypeStruct((N, R, Coutp), jnp.float32),
        grid_spec=pltpu.PrefetchScalarGridSpec(
            num_scalar_prefetch=0,
            grid=(N,),
            in_specs=[
                pl.BlockSpec((1, R, Coutp), lambda n: (n, 0, 0)),
                pl.BlockSpec((1, Coutp), lambda n: (0, 0)),
                pl.BlockSpec((1, Coutp), lambda n: (0, 0)),
            ],
            out_specs=pl.BlockSpec((1, R, Coutp), lambda n: (n, 0, 0)),
        ),
        compiler_params=pltpu.CompilerParams(
            dimension_semantics=("parallel",),
            vmem_limit_bytes=32 * 1024 * 1024,
        ),
        cost_estimate=pl.CostEstimate(flops=flops2, transcendentals=0, bytes_accessed=bytes2),
    )(y_conv, scale, shift)

    # Back to the module's NCHW output layout (an NHWC end-to-end pipeline would elide this).
    out = out[:, :, :Cout].reshape(N, OH, OW, Cout)
    return jnp.transpose(out, (0, 3, 1, 2))


if __name__ == "__main__":
    # Small, module-consistent shapes
    N, Cin, H, W = 2, 4, 16, 16
    Cout, k, stride = 8, 4, 2

    key = jax.random.PRNGKey(0)
    kx, kw, kb = jax.random.split(key, 3)

    x = jax.random.normal(kx, (N, Cin, H, W), dtype=jnp.float32)
    fan_in = Cin * k * k
    bound = 1.0 / math.sqrt(fan_in)
    w = jax.random.uniform(kw, (Cout, Cin, k, k), minval=-bound, maxval=bound, dtype=jnp.float32)
    b = jax.random.uniform(kb, (Cout,), minval=-bound, maxval=bound, dtype=jnp.float32)
    gamma = jnp.ones((Cout,), jnp.float32)
    beta = jnp.zeros((Cout,), jnp.float32)

    # TODO(synk): BatchNorm running-stat (momentum) updates are not modeled; they do not
    # affect the training-mode forward output computed here.
    y = generator_encoder_block(x, w, b, gamma, beta, stride=stride, kernel_size=k)
    jax.block_until_ready(y)
    assert y.shape == (N, Cout, 8, 8), y.shape

    # Loose reference check (pure-XLA f32): pad_same -> conv(+bias) -> train BN -> LeakyReLU.
    pad_h = get_same_padding(H, k, stride, 1)
    pad_w = get_same_padding(W, k, stride, 1)
    x_p = jnp.pad(x, ((0, 0), (0, 0),
                      (pad_h // 2, pad_h - pad_h // 2),
                      (pad_w // 2, pad_w - pad_w // 2)))
    conv = jax.lax.conv_general_dilated(
        x_p, w, window_strides=(stride, stride), padding="VALID",
        dimension_numbers=("NCHW", "OIHW", "NCHW"),
        preferred_element_type=jnp.float32) + b.reshape(1, Cout, 1, 1)
    mu = conv.mean(axis=(0, 2, 3), keepdims=True)
    var = ((conv - mu) ** 2).mean(axis=(0, 2, 3), keepdims=True)
    ref = (conv - mu) * jax.lax.rsqrt(var + 1e-5) * gamma.reshape(1, Cout, 1, 1) + beta.reshape(1, Cout, 1, 1)
    ref = jnp.where(ref >= 0, ref, 0.2 * ref)
    err = float(jnp.max(jnp.abs(y - ref)))
    assert err < 0.1, f"max abs err {err}"
    print("KERNEL_OK")
</pallas_src>

<mosaic_0001>
module attributes {stable_mosaic.version = 11 : i64} {
  func.func @_conv_stats_kernel(%arg0: i32, %arg1: memref<1x9x9x16xbf16, #tpu.memory_space<vmem>>, %arg2: memref<2x2x16x128xbf16, #tpu.memory_space<vmem>>, %arg3: memref<1x64x128xf32, #tpu.memory_space<vmem>>, %arg4: memref<1x128xf32, #tpu.memory_space<vmem>>, %arg5: memref<1x128xf32, #tpu.memory_space<vmem>>) attributes {dimension_semantics = [#tpu.dimension_semantics<arbitrary>], iteration_bounds = array<i64: 2>, scalar_prefetch = 0 : i64, scratch_operands = 0 : i64, tpu.core_type = #tpu.core_type<tc>, window_params = [{transform_indices = @transform_0, window_bounds = array<i64: 1, 9, 9, 16>}, {pipeline_mode = #tpu.pipeline_mode<synchronous>, transform_indices = @transform_1, window_bounds = array<i64: 2, 2, 16, 128>}, {transform_indices = @transform_2, window_bounds = array<i64: 1, 64, 128>}, {pipeline_mode = #tpu.pipeline_mode<synchronous>, transform_indices = @transform_3, window_bounds = array<i64: 1, 128>}, {pipeline_mode = #tpu.pipeline_mode<synchronous>, transform_indices = @transform_4, window_bounds = array<i64: 1, 128>}]} {
    %c0 = arith.constant 0 : index
    %c0_0 = arith.constant 0 : index
    %c0_1 = arith.constant 0 : index
    %c0_2 = arith.constant 0 : index
    %0 = vector.load %arg1[%c0, %c0_0, %c0_1, %c0_2] : memref<1x9x9x16xbf16, #tpu.memory_space<vmem>>, vector<1x9x9x16xbf16>
    %1 = vector.shape_cast %0 : vector<1x9x9x16xbf16> to vector<9x9x16xbf16>
    %c0_3 = arith.constant 0 : index
    %c0_4 = arith.constant 0 : index
    %c0_5 = arith.constant 0 : index
    %c0_6 = arith.constant 0 : index
    %2 = vector.load %arg2[%c0_3, %c0_4, %c0_5, %c0_6] : memref<2x2x16x128xbf16, #tpu.memory_space<vmem>>, vector<2x2x16x128xbf16>
    %cst = arith.constant 0.000000e+00 : f32
    %3 = vector.broadcast %cst : f32 to vector<64x128xf32>
    %4 = vector.extract_strided_slice %1 {offsets = [0, 0, 0], sizes = [8, 8, 16], strides = [1, 1, 1]} : vector<9x9x16xbf16> to vector<8x8x16xbf16>
    %5 = vector.shape_cast %4 : vector<8x8x16xbf16> to vector<64x16xbf16>
    %6 = vector.extract_strided_slice %2 {offsets = [0, 0, 0, 0], sizes = [1, 1, 16, 128], strides = [1, 1, 1, 1]} : vector<2x2x16x128xbf16> to vector<1x1x16x128xbf16>
    %7 = vector.shape_cast %6 : vector<1x1x16x128xbf16> to vector<16x128xbf16>
    %cst_7 = arith.constant dense<0.000000e+00> : vector<64x128xf32>
    %8 = tpu.matmul %5, %7, %cst_7 {dimension_numbers = #tpu.dot_dimension_numbers<[1], [0], [0], [1], [0, 0, 1, 1], [], []>} : vector<64x16xbf16>, vector<16x128xbf16>, vector<64x128xf32> -> vector<64x128xf32>
    %9 = arith.addf %3, %8 : vector<64x128xf32>
    %10 = vector.extract_strided_slice %1 {offsets = [0, 1, 0], sizes = [8, 8, 16], strides = [1, 1, 1]} : vector<9x9x16xbf16> to vector<8x8x16xbf16>
    %11 = vector.shape_cast %10 : vector<8x8x16xbf16> to vector<64x16xbf16>
    %12 = vector.extract_strided_slice %2 {offsets = [0, 1, 0, 0], sizes = [1, 1, 16, 128], strides = [1, 1, 1, 1]} : vector<2x2x16x128xbf16> to vector<1x1x16x128xbf16>
    %13 = vector.shape_cast %12 : vector<1x1x16x128xbf16> to vector<16x128xbf16>
    %cst_8 = arith.constant dense<0.000000e+00> : vector<64x128xf32>
    %14 = tpu.matmul %11, %13, %cst_8 {dimension_numbers = #tpu.dot_dimension_numbers<[1], [0], [0], [1], [0, 0, 1, 1], [], []>} : vector<64x16xbf16>, vector<16x128xbf16>, vector<64x128xf32> -> vector<64x128xf32>
    %15 = arith.addf %9, %14 : vector<64x128xf32>
    %16 = vector.extract_strided_slice %1 {offsets = [1, 0, 0], sizes = [8, 8, 16], strides = [1, 1, 1]} : vector<9x9x16xbf16> to vector<8x8x16xbf16>
    %17 = vector.shape_cast %16 : vector<8x8x16xbf16> to vector<64x16xbf16>
    %18 = vector.extract_strided_slice %2 {offsets = [1, 0, 0, 0], sizes = [1, 1, 16, 128], strides = [1, 1, 1, 1]} : vector<2x2x16x128xbf16> to vector<1x1x16x128xbf16>
    %19 = vector.shape_cast %18 : vector<1x1x16x128xbf16> to vector<16x128xbf16>
    %cst_9 = arith.constant dense<0.000000e+00> : vector<64x128xf32>
    %20 = tpu.matmul %17, %19, %cst_9 {dimension_numbers = #tpu.dot_dimension_numbers<[1], [0], [0], [1], [0, 0, 1, 1], [], []>} : vector<64x16xbf16>, vector<16x128xbf16>, vector<64x128xf32> -> vector<64x128xf32>
    %21 = arith.addf %15, %20 : vector<64x128xf32>
    %22 = vector.extract_strided_slice %1 {offsets = [1, 1, 0], sizes = [8, 8, 16], strides = [1, 1, 1]} : vector<9x9x16xbf16> to vector<8x8x16xbf16>
    %23 = vector.shape_cast %22 : vector<8x8x16xbf16> to vector<64x16xbf16>
    %24 = vector.extract_strided_slice %2 {offsets = [1, 1, 0, 0], sizes = [1, 1, 16, 128], strides = [1, 1, 1, 1]} : vector<2x2x16x128xbf16> to vector<1x1x16x128xbf16>
    %25 = vector.shape_cast %24 : vector<1x1x16x128xbf16> to vector<16x128xbf16>
    %cst_10 = arith.constant dense<0.000000e+00> : vector<64x128xf32>
    %26 = tpu.matmul %23, %25, %cst_10 {dimension_numbers = #tpu.dot_dimension_numbers<[1], [0], [0], [1], [0, 0, 1, 1], [], []>} : vector<64x16xbf16>, vector<16x128xbf16>, vector<64x128xf32> -> vector<64x128xf32>
    %27 = arith.addf %21, %26 : vector<64x128xf32>
    %c0_11 = arith.constant 0 : index
    %c0_12 = arith.constant 0 : index
    %c0_13 = arith.constant 0 : index
    %28 = vector.load %arg3[%c0_11, %c0_12, %c0_13] : memref<1x64x128xf32, #tpu.memory_space<vmem>>, vector<1x64x128xf32>
    %29 = vector.shape_cast %28 : vector<1x64x128xf32> to vector<64x128xf32>
    %30 = vector.shape_cast %27 : vector<64x128xf32> to vector<1x64x128xf32>
    tpu.vector_store %arg3[%c0_11, %c0_12, %c0_13], %30 {strides = array<i32>} : memref<1x64x128xf32, #tpu.memory_space<vmem>>, vector<1x64x128xf32>,
    %c0_i32 = arith.constant 0 : i32
    %31 = arith.cmpi eq, %arg0, %c0_i32 : i32
    %32 = arith.extui %31 : i1 to i32
    %c0_i32_14 = arith.constant 0 : i32
    %33 = arith.cmpi ne, %32, %c0_i32_14 : i32
    scf.if %33 {
      %cst_25 = arith.constant 0.000000e+00 : f32
      %45 = vector.broadcast %cst_25 : f32 to vector<1x128xf32>
      %c0_26 = arith.constant 0 : index
      %c0_27 = arith.constant 0 : index
      %46 = vector.load %arg4[%c0_26, %c0_27] : memref<1x128xf32, #tpu.memory_space<vmem>>, vector<1x128xf32>
      tpu.vector_store %arg4[%c0_26, %c0_27], %45 {strides = array<i32>} : memref<1x128xf32, #tpu.memory_space<vmem>>, vector<1x128xf32>,
      %cst_28 = arith.constant 0.000000e+00 : f32
      %47 = vector.broadcast %cst_28 : f32 to vector<1x128xf32>
      %c0_29 = arith.constant 0 : index
      %c0_30 = arith.constant 0 : index
      %48 = vector.load %arg5[%c0_29, %c0_30] : memref<1x128xf32, #tpu.memory_space<vmem>>, vector<1x128xf32>
      tpu.vector_store %arg5[%c0_29, %c0_30], %47 {strides = array<i32>} : memref<1x128xf32, #tpu.memory_space<vmem>>, vector<1x128xf32>,
    } else {
    }
    %c0_15 = arith.constant 0 : index
    %c0_16 = arith.constant 0 : index
    %34 = vector.load %arg4[%c0_15, %c0_16] : memref<1x128xf32, #tpu.memory_space<vmem>>, vector<1x128xf32>
    %cst_17 = arith.constant dense<0.000000e+00> : vector<128xf32>
    %35 = vector.multi_reduction <add>, %27, %cst_17 [0] : vector<64x128xf32> to vector<128xf32>
    %36 = vector.shape_cast %35 : vector<128xf32> to vector<1x128xf32>
    %37 = arith.addf %34, %36 : vector<1x128xf32>
    %c0_18 = arith.constant 0 : index
    %c0_19 = arith.constant 0 : index
    %38 = vector.load %arg4[%c0_18, %c0_19] : memref<1x128xf32, #tpu.memory_space<vmem>>, vector<1x128xf32>
    tpu.vector_store %arg4[%c0_18, %c0_19], %37 {strides = array<i32>} : memref<1x128xf32, #tpu.memory_space<vmem>>, vector<1x128xf32>,
    %c0_20 = arith.constant 0 : index
    %c0_21 = arith.constant 0 : index
    %39 = vector.load %arg5[%c0_20, %c0_21] : memref<1x128xf32, #tpu.memory_space<vmem>>, vector<1x128xf32>
    %40 = arith.mulf %27, %27 : vector<64x128xf32>
    %cst_22 = arith.constant dense<0.000000e+00> : vector<128xf32>
    %41 = vector.multi_reduction <add>, %40, %cst_22 [0] : vector<64x128xf32> to vector<128xf32>
    %42 = vector.shape_cast %41 : vector<128xf32> to vector<1x128xf32>
    %43 = arith.addf %39, %42 : vector<1x128xf32>
    %c0_23 = arith.constant 0 : index
    %c0_24 = arith.constant 0 : index
    %44 = vector.load %arg5[%c0_23, %c0_24] : memref<1x128xf32, #tpu.memory_space<vmem>>, vector<1x128xf32>
    tpu.vector_store %arg5[%c0_23, %c0_24], %43 {strides = array<i32>} : memref<1x128xf32, #tpu.memory_space<vmem>>, vector<1x128xf32>,
    return
  }
  func.func @transform_0(%arg0: i32) -> (i32, i32, i32, i32) {
    %c0_i32 = arith.constant 0 : i32
    %c0_i32_0 = arith.constant 0 : i32
    %c0_i32_1 = arith.constant 0 : i32
    %c0_i32_2 = arith.constant 0 : i32
    return %arg0, %c0_i32, %c0_i32_0, %c0_i32_1 : i32, i32, i32, i32
  }
  func.func @transform_1(%arg0: i32) -> (i32, i32, i32, i32) {
    %c0_i32 = arith.constant 0 : i32
    %c0_i32_0 = arith.constant 0 : i32
    %c0_i32_1 = arith.constant 0 : i32
    %c0_i32_2 = arith.constant 0 : i32
    %c0_i32_3 = arith.constant 0 : i32
    return %c0_i32, %c0_i32_0, %c0_i32_1, %c0_i32_2 : i32, i32, i32, i32
  }
  func.func @transform_2(%arg0: i32) -> (i32, i32, i32) {
    %c0_i32 = arith.constant 0 : i32
    %c0_i32_0 = arith.constant 0 : i32
    %c0_i32_1 = arith.constant 0 : i32
    return %arg0, %c0_i32, %c0_i32_0 : i32, i32, i32
  }
  func.func @transform_3(%arg0: i32) -> (i32, i32) {
    %c0_i32 = arith.constant 0 : i32
    %c0_i32_0 = arith.constant 0 : i32
    %c0_i32_1 = arith.constant 0 : i32
    return %c0_i32, %c0_i32_0 : i32, i32
  }
  func.func @transform_4(%arg0: i32) -> (i32, i32) {
    %c0_i32 = arith.constant 0 : i32
    %c0_i32_0 = arith.constant 0 : i32
    %c0_i32_1 = arith.constant 0 : i32
    return %c0_i32, %c0_i32_0 : i32, i32
  }
}

</mosaic_0001>

<bundles_post_ra>
// kernel: tpu_custom_call.1
= control target key start
LH: loop header
LB: loop body
LE: loop exit
PB: predicated region body
PF: predicated region fallthrough
CT: control target
= control target key end

     0   :  { %10 = vsyncpa [#allocation3], 0  ;;  %s1578_s0 = inlined_call_operand.vmem [shape: bf16[2,9,9,16], index: 0, kind: input, shape index: {}]   ;;  %s1579_s1 = inlined_call_operand.vmem [shape: bf16[2,2,16,128], index: 1, kind: input, shape index: {}]   ;;  %s1580_s2 = inlined_call_operand.hbm [shape: f32[2,64,128], index: 2, kind: output, shape index: {0}]   ;;  %s1581_s3 = inlined_call_operand.hbm [shape: f32[1,128], index: 3, kind: output, shape index: {1}]   ;;  %s1582_s4 = inlined_call_operand.hbm [shape: f32[1,128], index: 4, kind: output, shape index: {2}]  }
   0x1   :  { %12 = vsyncpa [#allocation3 + $0x1], 0 }
   0x2   :  { %13 = vsyncpa [#allocation5], 0  ;;  %s1270_s15 = smov 0   ;;  %s1272_s16 = smov 0  }
   0x3   :  { %s1274_s17 = smov 0   ;;  %s1276_s18 = smov 0  }
   0x4 LB: > { %s1291_s19 = sadd.s32 4294967295, %s1237_s18   ;;  %s913_s20 = sadd.s32 4294967294, %s1237_s18   ;;  %s1237_s18 = sphi %s1276_s18, %s1590_s18   ;;  %s1233_s17 = sphi %s1274_s17, %s1589_s17   ;;  %s1229_s16 = sphi %s1272_s16, %s1588_s16   ;;  %s1225_s15 = sphi %s1270_s15, %s1587_s15  }
   0x5   : > { %s1295_s21 = sadd.s32 1, %s1237_s18   ;;  %s73_s22 = sadd.s32 1, %s1233_s17 }
   0x6   : > { %s70_s23 = ssub.s32 %s1237_s18, %s1295_s21  ;;  %p83_p0 = scmp.ne.s32.totalorder %s1233_s17, %s1229_s16 }
   0x7   : > { %p71_p1 = scmp.eq.s32.totalorder %s70_s23, 0  ;;  %p84_p2 = scmp.eq.s32.totalorder %s1291_s19, 1 }
   0x8   : > { %p89_p3 = scmp.ne.s32.totalorder %s1229_s16, %s1225_s15  ;;  %p90_p4 = scmp.eq.s32.totalorder %s913_s20, 1 }
   0x9   : > { %s1306_s24 = scalar_select %p71_p1, %s1233_s17, %s73_s22  }
   0xa   : > { %p1310_p5 = por %p84_p2, %p83_p0  ;;  %p1314_p6 = por %p90_p4, %p89_p3 }
   0xb   : > { %p916_p7 = scmp.ge.s32.totalorder %s1237_s18, 1  ;;  %p161_p8 = scmp.lt.s32.totalorder %s1237_s18, 3 }
   0xd   : > { %p162_p9 = pnand %p916_p7, %p161_p8 }
   0xe   : > { %v1107_v0 = vld [vmem:[%s1579_s1 + $0x10] sm:$0xff] (!%p162_p9)   ;;  %p187_p10 = scmp.lt.s32.totalorder (!%p162_p9), %s1291_s19, 1  ;;  %v1111_v1 = vld [vmem:[%s1579_s1 + $0x8] sm:$0xff] (!%p162_p9)   ;;  %v1331_v2 = vld [vmem:[%s1579_s1] sm:$0xff] (!%p162_p9)   ;;  %vm352_vm0 = vcmask (!%p162_p9), 130048   ;;  %s180_s14 = sand.u32 (!%p162_p9), 1, %s1229_s16  }
   0xf   : > { %165 = sbr.rel (%p162_p9) target bundleno = 368 (0x170), region = 28  ;;  %1006 = vmatprep.subr.bf16.mxu0 (!%p162_p9), %v1107_v0  ;;  %986 = vmatprep.subr.bf16.mxu1 (!%p162_p9), %v1111_v1  ;;  %v1115_v3 = vld [vmem:[%s1579_s1 + $0x18] sm:$0xff] (!%p162_p9)   ;;  %vm219_vm1 = vsmask.f32 (!%p162_p9), 3328  ;;  %vm220_vm2 = vsmask.f32 (!%p162_p9), 7440 }
  0x10   : > { %1007 = vmatpush3.bf16.msra.mxu0 (!%p162_p9), %v1107_v0  ;;  %987 = vmatpush3.bf16.msra.mxu1 (!%p162_p9), %v1111_v1  ;;  %vm1391_vm3 = vmor (!%p162_p9), %vm219_vm1, %vm220_vm2  ;;  %s917_s20 = sshll.u32 (!%p162_p9), %s180_s14, 6  ;;  %p955_p11 = scmp.ne.s32.totalorder (!%p162_p9), %s1291_s19, 0 }
  0x11   : > { %996 = vmatprep.subr.bf16.mxu1 (!%p162_p9), %v1331_v2  ;;  %1016 = vmatprep.subr.bf16.mxu0 (!%p162_p9), %v1115_v3  ;;  %s1455_s22 = scalar_lea.vmem (!%p162_p9), [#allocation2], %s917_s20 }
  0x16   : > { %s188_s5 = scalar_select %p187_p10, %s1291_s19, 1 }
  0x18   : > { %s1050_s8 = smul.u32 72, %s188_s5 }
  0x1a   : > { %s1340_s13 = scalar_lea.vmem %s1578_s0, %s1050_s8 }
  0x1b   : > { %v1343_v4 = vld [vmem:[%s1340_s13 + $0x8] sm:$0xf]  ;;  %v1346_v5 = vld [vmem:[%s1340_s13 + $0x10] sm:$0xf]  ;;  %v1349_v6 = vld [vmem:[%s1340_s13 + $0x18] sm:$0xf] }
  0x1c   : > { %v251_v7 = vshrl.u32 %v1346_v5, 16  ;;  %v254_v8 = vshll.u32 %v1346_v5, 16  ;;  %v1354_v9 = vld [vmem:[%s1340_s13 + $0x20] sm:$0xf]  ;;  %v237_v10 = vshrl.u32 %v1343_v4, 16  ;;  %v240_v11 = vshll.u32 %v1343_v4, 16 }
  0x1d   : > { %v937_v12 = vcombine.low %v1343_v4, %v1346_v5  ;;  %v1361_v13 = vld [vmem:[%s1340_s13 + $0x28] sm:$0xf]  ;;  %v1364_v14 = vld [vmem:[%s1340_s13 + $0x30] sm:$0xf]  ;;  %v279_v17 = vshrl.u32 %v1354_v9, 16  ;;  %v938_v18 = vcombine.low %v1349_v6, %v1354_v9  ;;  %v282_v20 = vshll.u32 %v1354_v9, 16 }
  0x1e   : > { %v253_v15 = vrot.slane %v251_v7, 4  ;;  %v256_v16 = vrot.slane %v254_v8, 5  ;;  %v1370_v19 = vld [vmem:[%s1340_s13] sm:$0xf]  ;;  %v293_v21 = vshrl.u32 %v1361_v13, 16  ;;  %v296_v22 = vshll.u32 %v1361_v13, 16 }
  0x1f   : > { %1008 = vmatprep.mubr.msk.bf16.mxu0 %vm352_vm0, %v937_v12  ;;  %v939_v23 = vcombine.low %v1361_v13, %v1364_v14  ;;  %v194_v24 = vld [vmem:[%s1340_s13 + $0x4] sm:$0x1]  ;;  %v307_v25 = vshrl.u32 %v1364_v14, 16  ;;  %v310_v26 = vshll.u32 %v1364_v14, 16  ;;  %v196_v27 = vld [vmem:[%s1340_s13 + $0xc] sm:$0x1]  ;;  %v929_v40 = vcombine.low %v1346_v5, %v1349_v6 }
  0x20   : > { %1009 = vmatmul.mubr.msk.bf16.vlgmr.msra.gmra.mrb[0].mxu0 %vm352_vm0, %v938_v18  ;;  %v198_v28 = vld [vmem:[%s1340_s13 + $0x14] sm:$0x1]  ;;  %v257_v29 = vor.u32 %v256_v16, %v253_v15  ;;  %v223_v30 = vshrl.u32 %v1370_v19, 16  ;;  %v226_v31 = vshll.u32 %v1370_v19, 16  ;;  %v232_v32 = vshll.u32 %v194_v24, 16 }
  0x21   : > { %1012 = vmatprep.mubr.msk.bf16.mxu0 %vm352_vm0, %v939_v23  ;;  %v239_v33 = vrot.slane %v237_v10, 4  ;;  %1017 = vmatpush3.bf16.msra.mxu0 %v1115_v3  ;;  %v200_v34 = vld [vmem:[%s1340_s13 + $0x1c] sm:$0x1]  ;;  %v242_v35 = vrot.slane %v240_v11, 5  ;;  %v246_v36 = vshll.u32 %v196_v27, 16  ;;  %v260_v38 = vshll.u32 %v198_v28, 16 }
  0x22   : > { %v258_v37 = vrot.slane %v257_v29, 4  ;;  %v202_v39 = vld [vmem:[%s1340_s13 + $0x24] sm:$0x1]  ;;  %v225_v41 = vrot.slane %v223_v30, 4  ;;  %v228_v42 = vrot.slane %v226_v31, 5  ;;  %v234_v43 = vrot.slane %v232_v32, 5 }
  0x23   : > { %v265_v44 = vshrl.u32 %v1349_v6, 16  ;;  %v243_v45 = vor.u32 %v242_v35, %v239_v33  ;;  %v248_v46 = vrot.slane %v246_v36, 5  ;;  %v262_v47 = vrot.slane %v260_v38, 5  ;;  %v1398_v49 = vld [vmem:[%s1340_s13 + $0x38] sm:$0xf] }
  0x24   : > { %v268_v48 = vshll.u32 %v1349_v6, 16  ;;  %v229_v50 = vor.u32 %v228_v42, %v225_v41  ;;  %v274_v52 = vshll.u32 %v200_v34, 16  ;;  %v281_v53 = vrot.slane %v279_v17, 4  ;;  %v209_v58 = vld [vmem:[%s1340_s13 + $0x40] sm:$0xf] }
  0x25   : > { %v267_v51 = vrot.slane %v265_v44, 4  ;;  %v244_v54 = vrot.slane %v243_v45, 4  ;;  %v263_v55 = vsel %vm1391_vm3, %v258_v37, %v262_v47  ;;  %v284_v57 = vrot.slane %v282_v20, 5  ;;  %v204_v7 = vld [vmem:[%s1340_s13 + $0x2c] sm:$0x1] }
  0x26   : > { %v270_v56 = vrot.slane %v268_v48, 5  ;;  %v230_v59 = vrot.slane %v229_v50, 4  ;;  %v276_v60 = vrot.slane %v274_v52, 5  ;;  %v288_v61 = vshll.u32 %v202_v39, 16  ;;  %v206_v28 = vld [vmem:[%s1340_s13 + $0x34] sm:$0x1] }
  0x27   : > { %v321_v62 = vshrl.u32 %v1398_v49, 16  ;;  %v249_v63 = vsel %vm1391_vm3, %v244_v54, %v248_v46  ;;  %v285_v1 = vor.u32 %v284_v57, %v281_v53  ;;  %v324_v3 = vshll.u32 %v1398_v49, 16  ;;  %v208_v32 = vld [vmem:[%s1340_s13 + $0x3c] sm:$0x1]  ;;  %v210_v36 = vld [vmem:[%s1340_s13 + $0x44] sm:$0x1] }
  0x28   : > { %v271_v0 = vor.u32 %v270_v56, %v267_v51  ;;  %v235_v8 = vsel %vm1391_vm3, %v230_v59, %v234_v43  ;;  %v290_v10 = vrot.slane %v288_v61, 5  ;;  %v946_v11 = vcombine.low %v249_v63, %v263_v55 }
  0x29   : > { %v940_v12 = vcombine.low %v1398_v49, %v209_v58  ;;  %v286_v16 = vrot.slane %v285_v1, 4  ;;  %v919_v17 = vcombine.low %v235_v8, %v249_v63  ;;  %v631_v18 = vshrl.u32 %v209_v58, 16 }
  0x2a   : > { %v272_v15 = vrot.slane %v271_v0, 4  ;;  %v634_v20 = vshll.u32 %v209_v58, 16  ;;  %v295_v23 = vrot.slane %v293_v21, 4  ;;  %v298_v24 = vrot.slane %v296_v22, 5 }
  0x2b   : > { %1013 = vmatmul.mubr.msk.bf16.gmra.mrb[4].mxu0 %vm352_vm0, %v940_v12  ;;  %v302_v27 = vshll.u32 %v204_v7, 16  ;;  %v291_v30 = vsel %vm1391_vm3, %v286_v16, %v290_v10  ;;  %988 = vmatprep.mubr.msk.bf16.mxu1 %vm352_vm0, %v919_v17  ;;  %v633_v31 = vrot.slane %v631_v18, 4  ;;  %v309_v33 = vrot.slane %v307_v25, 4 }
  0x2c   : > { %v277_v29 = vsel %vm1391_vm3, %v272_v15, %v276_v60  ;;  %1018 = vmatprep.mubr.msk.bf16.mxu0 %vm352_vm0, %v946_v11  ;;  %v636_v22 = vrot.slane %v634_v20, 5  ;;  %v299_v35 = vor.u32 %v298_v24, %v295_v23  ;;  %v312_v38 = vrot.slane %v310_v26, 5 }
  0x2d   : > { %v920_v34 = vcombine.low %v263_v55, %v277_v29  ;;  %v947_v21 = vcombine.low %v277_v29, %v291_v30  ;;  %v304_v37 = vrot.slane %v302_v27, 5  ;;  %v316_v39 = vshll.u32 %v206_v28, 16 }
  0x2e   : > { %v323_v41 = vrot.slane %v321_v62, 4  ;;  %v300_v42 = vrot.slane %v299_v35, 4  ;;  %v326_v43 = vrot.slane %v324_v3, 5  ;;  %v330_v44 = vshll.u32 %v208_v32, 16 }
  0x2f   : > { %989 = vmatmul.mubr.msk.bf16.vlgmr.msra.gmra.mrb[0].mxu1 %vm352_vm0, %v920_v34  ;;  %v637_v45 = vor.u32 %v636_v22, %v633_v31  ;;  %v313_v25 = vor.u32 %v312_v38, %v309_v33  ;;  %v318_v46 = vrot.slane %v316_v39, 5  ;;  %v640_v47 = vshll.u32 %v210_v36, 16 }
  0x30   : > { %997 = vmatpush3.bf16.msra.mxu1 %v1331_v2  ;;  %v305_v48 = vsel %vm1391_vm3, %v300_v42, %v304_v37  ;;  %v327_v50 = vor.u32 %v326_v43, %v323_v41  ;;  %v332_v51 = vrot.slane %v330_v44, 5  ;;  %v928_v59 = vcombine.low %v1370_v19, %v1343_v4 }
  0x31   : > { %v638_v52 = vrot.slane %v637_v45, 4  ;;  %v921_v26 = vcombine.low %v291_v30, %v305_v48  ;;  %v314_v53 = vrot.slane %v313_v25, 4  ;;  %v642_v54 = vrot.slane %v640_v47, 5 }
  0x32   : > { %v328_v55 = vrot.slane %v327_v50, 4  ;;  %v930_v62 = vcombine.low %v1354_v9, %v1361_v13  ;;  %v931_v4 = vcombine.low %v1364_v14, %v1398_v49  ;;  %v1239_v28 = vmov (!%p955_p11), 0.0  }
  0x33   : > { %1019 = vmatmul.mubr.msk.bf16.vlgmr.msra.gmra.mrb[0].mxu0 %vm352_vm0, %v947_v21  ;;  %992 = vmatprep.mubr.msk.bf16.mxu1 %vm352_vm0, %v921_v26  ;;  %v319_v2 = vsel %vm1391_vm3, %v314_v53, %v318_v46  ;;  %v643_v56 = vsel %vm1391_vm3, %v638_v52, %v642_v54  ;;  %752 = vst [vmem:[#allocation4] sm:$0x1] (!%p955_p11), %v1239_v28  ;;  %753 = vst [vmem:[#allocation6] sm:$0x1] (!%p955_p11), %v1239_v28 }
  0x34   : > { %v333_v57 = vsel %vm1391_vm3, %v328_v55, %v332_v51  ;;  %v948_v58 = vcombine.low %v305_v48, %v319_v2 }
  0x35   : > { %v922_v60 = vcombine.low %v319_v2, %v333_v57  ;;  %v949_v61 = vcombine.low %v333_v57, %v643_v56 }
  0x36   : > { %1022 = vmatprep.mubr.msk.bf16.mxu0 %vm352_vm0, %v948_v58 }
  0x37   : > { %993 = vmatmul.mubr.msk.bf16.gmra.mrb[4].mxu1 %vm352_vm0, %v922_v60 }
  0x38   : > { %998 = vmatprep.mubr.msk.bf16.mxu1 %vm352_vm0, %v928_v59 }
  0x3b   : > { %1023 = vmatmul.mubr.msk.bf16.gmra.mrb[4].mxu0 %vm352_vm0, %v949_v61 }
  0x3f   : > { %999 = vmatmul.mubr.msk.bf16.vlgmr.msra.gmra.mrb[0].mxu1 %vm352_vm0, %v929_v40 }
  0x40   : > { %1002 = vmatprep.mubr.msk.bf16.mxu1 %vm352_vm0, %v930_v62 }
  0x47   : > { %1003 = vmatmul.mubr.msk.bf16.gmra.mrb[4].mxu1 %vm352_vm0, %v931_v4 }
 0x106   : > { %v1020_v19 = vpop.f32.mrb[0].mxu0 }
 0x107   : > { %v701_v63 = vpop.f32.mrb[1].mxu0 }
 0x108   : > { %v1021_v0 = vpop.f32.mrb[2].mxu0 }
 0x109   : > { %v704_v1 = vpop.f32.mrb[3].mxu0 }
 0x10e   : > { %v1024_v3 = vpop.f32.mrb[4].mxu0 }
 0x10f   : > { %v717_v7 = vpop.f32.mrb[5].mxu0 }
 0x110   : > { %v1025_v5 = vpop.f32.mrb[6].mxu0 }
 0x111   : > { %v720_v6 = vpop.f32.mrb[7].mxu0 }
 0x112   : > { %v1000_v9 = vpop.f32.mrb[0].mxu1 }
 0x113   : > { %v1026_v13 = vadd.f32 %v1020_v19, %v1000_v9  ;;  %v502_v8 = vpop.f32.mrb[1].mxu1 }
 0x114   : > { %v1027_v10 = vadd.f32 %v701_v63, %v502_v8  ;;  %v1001_v11 = vpop.f32.mrb[2].mxu1 }
 0x115   : > { %742 = vst [vmem:[%s1455_s22 + $0x10] sm:$0xff] %v1026_v13  ;;  %v1028_v14 = vadd.f32 %v1021_v0, %v1001_v11  ;;  %v505_v49 = vpop.f32.mrb[3].mxu1 }
 0x116   : > { %740 = vst [vmem:[%s1455_s22] sm:$0xff] %v1027_v10  ;;  %v1029_v12 = vadd.f32 %v704_v1, %v505_v49 }
 0x117   : > { %743 = vst [vmem:[%s1455_s22 + $0x18] sm:$0xff] %v1028_v14 }
 0x118   : > { %741 = vst [vmem:[%s1455_s22 + $0x8] sm:$0xff] %v1029_v12 }
 0x11a   : > { %v1004_v15 = vpop.f32.mrb[4].mxu1  ;;  %751 = sbr.rel (%p955_p11) target bundleno = 289 (0x121), region = 32 }
 0x11b   : > { %v1461_v16 = vadd.f32 %v1024_v3, %v1004_v15  ;;  %v518_v17 = vpop.f32.mrb[5].mxu1 }
 0x11c   : > { %v1031_v18 = vadd.f32 %v717_v7, %v518_v17  ;;  %v1005_v20 = vpop.f32.mrb[6].mxu1 }
 0x11d   : > { %746 = vst [vmem:[%s1455_s22 + $0x30] sm:$0xff] %v1461_v16  ;;  %v1465_v23 = vadd.f32 %v1025_v5, %v1005_v20  ;;  %v521_v24 = vpop.f32.mrb[7].mxu1 }
 0x11e   : > { %744 = vst [vmem:[%s1455_s22 + $0x20] sm:$0xff] %v1031_v18  ;;  %v1033_v27 = vadd.f32 %v720_v6, %v521_v24 }
 0x11f   : > { %747 = vst [vmem:[%s1455_s22 + $0x38] sm:$0xff] %v1465_v23 }
 0x120   : > { %745 = vst [vmem:[%s1455_s22 + $0x28] sm:$0xff] %v1033_v27 }
 0x121 PF: > { %v755_v29 = vadd.f32 %v1029_v12, %v1027_v10  ;;  %v771_v30 = vmul.f32 %v1027_v10, %v1027_v10  ;;  %v772_v31 = vmul.f32 %v1029_v12, %v1029_v12  ;;  %v773_v32 = vmul.f32 %v1026_v13, %v1026_v13  ;;  %s965_s23 = sshll.u32 %s1291_s19, 10  ;;  %s808_s30 = sshll.u32 %s1455_s22, 4  ;;  %s1479_s30 = int_to_ptr.vmem [resolvable:$true] %s808_s30 }
 0x122   : > { %v774_v34 = vmul.f32 %v1028_v14, %v1028_v14  ;;  %s1476_s29 = scalar_lea.hbm %s1580_s2, %s965_s23  ;;  %v775_v35 = vmul.f32 %v1031_v18, %v1031_v18  ;;  %v776_v38 = vmul.f32 %v1033_v27, %v1033_v27  ;;  %s1483_s5 = scalar_lea.sflag [#allocation3], %s180_s14 }
 0x123   : > { %v756_v33 = vadd.f32 %v1026_v13, %v755_v29  ;;  %v779_v21 = vadd.f32 %v772_v31, %v771_v30  ;;  %s1119_s6 = scalar_lea.vmem %s1479_s30, 1024  ;;  %s1240_s7 = smov [#allocation2]  }
 0x124   : > { %p1120_p12 = scmp.ne.s32.totalorder %s1479_s30, %s1119_s6  ;;  %s1123_s8 = sshll.u32 %s1240_s7, 4  ;;  %s1124_s8 = int_to_ptr.vmem [resolvable:$false] %s1123_s8 }
 0x125   : > { %v757_v22 = vadd.f32 %v1028_v14, %v756_v33  ;;  %v780_v36 = vadd.f32 %v779_v21, %v773_v32  ;;  %s1125_s9 = scalar_lea.vmem %s1124_s8, 2048  ;;  %p1126_p1 = scmp.lt.s32.totalorder %s1479_s30, %s1124_s8 }
 0x126   : > { %p1121_p13 = pnand %p1120_p12, %p1310_p5  ;;  %p1127_p3 = scmp.lt.s32.totalorder %s1125_s9, %s1119_s6 }
 0x127   : > { %v758_v37 = vadd.f32 %v1031_v18, %v757_v22  ;;  %v781_v39 = vadd.f32 %v780_v36, %v774_v34 }
 0x128   : > { %p1122_p0 = pneg %p1121_p13  ;;  %p1128_p4 = por %p1127_p3, %p1126_p1 }
 0x12a   : > { %p1129_p7 = pnand %p1128_p4, %p1122_p0 }
 0x12c   : > { %1132 = shalt.err (!%p1129_p7)
}
 0x12d   : > { %s1133_s10 = scalar_lea.hbm %s1476_s29, 1024  ;;  %s1137_s13 = scalar_lea.hbm %s1580_s2, 2048 }
 0x12e   : > { %p1134_p8 = scmp.ne.s32.totalorder %s1476_s29, %s1133_s10  ;;  %p1138_p11 = scmp.lt.u32.totalorder %s1476_s29, %s1580_s2 }
 0x12f   : > { %p1139_p12 = scmp.lt.u32.totalorder %s1137_s13, %s1133_s10  ;;  %p1141_p0 = scmp.lt.u32.totalorder %s1133_s10, %s1476_s29 }
 0x130   : > { %p1135_p9 = pnand %p1134_p8, %p1310_p5 }
 0x131   : > { %p1140_p13 = por %p1139_p12, %p1138_p11 }
 0x132   : > { %p1136_p10 = pneg %p1135_p9 }
 0x133   : > { %p1142_p1 = por %p1141_p0, %p1140_p13 }
 0x135   : > { %p1143_p3 = pnand %p1142_p1, %p1136_p10 }
 0x137   : > { %1146 = shalt.err (!%p1143_p3)
}
 0x138   : > { %s1241_s22 = smov 128   ;;  %s1242_s23 = smov 8   ;;  %v759_v41 = vadd.f32 %v1033_v27, %v758_v37  ;;  %v777_v42 = vmul.f32 %v1461_v16, %v1461_v16  ;;  %v782_v43 = vadd.f32 %v781_v39, %v775_v35  ;;  %v778_v45 = vmul.f32 %v1465_v23, %v1465_v23  ;;  %v754_v57 = vld [vmem:[#allocation4] sm:$0x1]  ;;  %v770_v60 = vld [vmem:[#allocation6] sm:$0x1] }
 0x139   : > { %1051 = dma.vmem_to_hbm [thread:$0]  (%p1310_p5), %s1479_s30, 1024, %s1476_s29, %s1483_s5, %s1241_s22, %s1241_s22, %s1242_s23  }
 0x13a   : > { %v760_v44 = vadd.f32 %v1461_v16, %v759_v41  ;;  %v783_v25 = vadd.f32 %v782_v43, %v776_v38  ;;  %s1243_s25 = smov [#allocation4]   ;;  %s1244_s28 = smov [#allocation6]  }
 0x13b   : > { %s822_s27 = sshll.u32 %s1243_s25, 4  ;;  %s833_s29 = sshll.u32 %s1244_s28, 4  ;;  %s823_s27 = int_to_ptr.vmem [resolvable:$true] %s822_s27  ;;  %s1513_s29 = int_to_ptr.vmem [resolvable:$true] %s833_s29 }
 0x13c   : > { %v761_v46 = vadd.f32 %v1465_v23, %v760_v44  ;;  %v784_v47 = vadd.f32 %v783_v25, %v777_v42  ;;  %s1147_s30 = scalar_lea.vmem %s823_s27, 16  ;;  %s1153_s5 = scalar_lea.vmem %s823_s27, 32 }
 0x13d   : > { %p1148_p5 = scmp.ne.s32.totalorder %s823_s27, %s1147_s30  ;;  %p1154_p8 = scmp.lt.s32.totalorder %s823_s27, %s823_s27 }
 0x13e   : > { %v762_v48 = vrot.slane %v761_v46, 4  ;;  %v785_v50 = vadd.f32 %v784_v47, %v778_v45  ;;  %p1155_p9 = scmp.lt.s32.totalorder %s1153_s5, %s1147_s30 }
 0x13f   : > { %p1149_p4 = pnand %p1148_p5, %p84_p2 }
 0x140   : > { %v763_v51 = vadd.f32 %v762_v48, %v761_v46  ;;  %v786_v52 = vrot.slane %v785_v50, 4  ;;  %p1156_p10 = por %p1155_p9, %p1154_p8 }
 0x141   : > { %p1150_p7 = pneg %p1149_p4 }
 0x142   : > { %v764_v26 = vrot.slane %v763_v51, 2  ;;  %v787_v53 = vadd.f32 %v786_v52, %v785_v50 }
 0x143   : > { %p1157_p11 = pnand %p1156_p10, %p1150_p7 }
 0x144   : > { %v765_v54 = vadd.f32 %v764_v26, %v763_v51  ;;  %v788_v55 = vrot.slane %v787_v53, 2 }
 0x146   : > { %v766_v2 = vrot.slane %v765_v54, 1  ;;  %v789_v56 = vadd.f32 %v788_v55, %v787_v53 }
 0x148   : > { %v767_v58 = vadd.f32 %v766_v2, %v765_v54  ;;  %v790_v59 = vrot.slane %v789_v56, 1 }
 0x14a   : > { %v768_v61 = vadd.f32 %v767_v58, %v754_v57  ;;  %v791_v40 = vadd.f32 %v790_v59, %v789_v56 }
 0x14c   : > { %769 = vst [vmem:[#allocation4] sm:$0x1] %v768_v61  ;;  %v792_v62 = vadd.f32 %v791_v40, %v770_v60 }
 0x14d   : > { %1160 = shalt.err (!%p1157_p11)
}
 0x14e   : > { %s1161_s8 = scalar_lea.hbm %s1581_s3, 16 }
 0x14f   : > { %p1162_p12 = scmp.ne.s32.totalorder %s1581_s3, %s1161_s8  ;;  %p1167_p1 = scmp.lt.u32.totalorder %s1161_s8, %s1581_s3 }
 0x151   : > { %p1163_p13 = pnand %p1162_p12, %p84_p2 }
 0x153   : > { %p1164_p0 = pneg %p1163_p13 }
 0x155   : > { %p1169_p3 = pnand %p1167_p1, %p1164_p0 }
 0x157   : > { %1172 = shalt.err (!%p1169_p3)
}
 0x158   : > { %1053 = dma.vmem_to_hbm [thread:$0]  (%p84_p2), %s823_s27, 16, %s1581_s3, [#allocation5]   ;;  %793 = vst [vmem:[#allocation6] sm:$0x1] %v792_v62 }
 0x159   : > { %s1173_s20 = scalar_lea.vmem %s1513_s29, 16  ;;  %s1179_s22 = scalar_lea.vmem %s1513_s29, 32 }
 0x15a   : > { %p1174_p5 = scmp.ne.s32.totalorder %s1513_s29, %s1173_s20  ;;  %p1180_p8 = scmp.lt.s32.totalorder %s1513_s29, %s1513_s29 }
 0x15b   : > { %p1181_p9 = scmp.lt.s32.totalorder %s1179_s22, %s1173_s20 }
 0x15c   : > { %p1175_p4 = pnand %p1174_p5, %p84_p2 }
 0x15d   : > { %p1182_p10 = por %p1181_p9, %p1180_p8 }
 0x15e   : > { %p1176_p7 = pneg %p1175_p4 }
 0x160   : > { %p1183_p11 = pnand %p1182_p10, %p1176_p7 }
 0x162   : > { %1186 = shalt.err (!%p1183_p11)
}
 0x163   : > { %s1187_s28 = scalar_lea.hbm %s1582_s4, 16 }
 0x164   : > { %p1188_p12 = scmp.ne.s32.totalorder %s1582_s4, %s1187_s28  ;;  %p1193_p1 = scmp.lt.u32.totalorder %s1187_s28, %s1582_s4 }
 0x166   : > { %p1189_p13 = pnand %p1188_p12, %p84_p2 }
 0x168   : > { %p1190_p0 = pneg %p1189_p13 }
 0x16a   : > { %p1195_p3 = pnand %p1193_p1, %p1190_p0 }
 0x16c   : > { %1198 = shalt.err (!%p1195_p3)
}
 0x16d   : > { %1055 = dma.vmem_to_hbm [thread:$0]  (%p84_p2), %s1513_s29, 16, %s1582_s4, [#allocation5]  }
 0x16e   : > { %1216 = dma.done.wait (%p84_p2), [#allocation5], 32  }
 0x16f   : > { %1218 = vsyncadd (%p84_p2), [#allocation5], 4294967264 }
 0x170 PF: > { %p1069_p5 = scmp.ge.s32.totalorder %s1237_s18, 2  ;;  %s853_s9 = sand.u32 1, %s1225_s15  }
 0x171   : > { %s854_s10 = scalar_lea.sflag [#allocation3], %s853_s9 }
 0x172   : > { %p1062_p4 = pnand %p1069_p5, %p1314_p6 }
 0x174   : > { %1220 = dma.done.wait (!%p1062_p4), %s854_s10, 1024  }
 0x175   : > { %1222 = vsyncadd (!%p1062_p4), %s854_s10, 4294966272  ;;  %p16_p7 = scmp.ge.s32.totalorder %s1295_s21, 4   ;;  %s1587_s15 = smov %s1229_s16 }
 0x176   : > { %s1588_s16 = smov %s1233_s17  ;;  %s1589_s17 = smov %s1306_s24 }
 0x177   : > { %s1590_s18 = smov %s1295_s21  ;;  %18 = sbr.rel (!%p16_p7) target bundleno = 4 (0x4), region = 83 }
 0x17e   :  { %859 = vsyncpa [#allocation3], 1 }
 0x17f   :  { %861 = vsyncpa [#allocation3 + $0x1], 1 }
 0x180   :  { %862 = vsyncpa [#allocation5], 1 }

</bundles_post_ra>
